<compile_context>
chip_gen: v5e
topology: v5e:2x2
jax: 0.10.0
libtpu: 0.0.40
codegen_flags: <defaults>
</compile_context>

<pallas_src>
import jax
import jax.numpy as jnp
from jax import lax
from jax.experimental import pallas as pl
from jax.experimental.pallas import tpu as pltpu


def _lstm_fc_kernel(gx_ref, whh_ref, wfc_ref, bfc_ref, pred_ref):
    """LSTM recurrence (input projection pre-hoisted) + final FC.

    gx_ref  : [T, B, 4H]  precomputed x @ W_ih + b, time-major,
                          gate order (i, f, o, g)
    whh_ref : [H, 4H]     hidden->gates weight (pre-transposed, permuted)
    wfc_ref : [1, H]      fc weight (torch layout, row vector)
    bfc_ref : [1, 1]      fc bias
    pred_ref: [B, 1]      output
    """
    T, B, _ = gx_ref.shape
    H = whh_ref.shape[0]

    h0 = jnp.zeros((B, H), jnp.float32)
    c0 = jnp.zeros((B, H), jnp.float32)

    def step(t, carry):
        h, c = carry
        # Only the hidden->gates matmul sits on the serial path.
        gates = (
            jnp.dot(h, whh_ref[...], preferred_element_type=jnp.float32)
            + gx_ref[t]
        )                                              # [B, 4H]
        # Permuted gate order (i, f, o, g): one wide sigmoid, one tanh.
        sig = jax.nn.sigmoid(gates[:, : 3 * H])
        g_g = jnp.tanh(gates[:, 3 * H:])
        i_g = sig[:, 0 * H:1 * H]
        f_g = sig[:, 1 * H:2 * H]
        o_g = sig[:, 2 * H:3 * H]

        c_new = f_g * c + i_g * g_g
        h_new = o_g * jnp.tanh(c_new)
        return h_new, c_new

    # T is static and small -> fully unroll the recurrence.
    h, _ = lax.fori_loop(0, T, step, (h0, c0), unroll=True)

    # Dropout(p=0.0) is the identity; final FC as a lane reduction (no MXU).
    pred_ref[...] = (
        jnp.sum(h * wfc_ref[...], axis=1, keepdims=True) + bfc_ref[...]
    ).astype(pred_ref.dtype)


def _permute_gates_last_dim(w):
    """Reorder last-dim gate blocks from PyTorch (i, f, g, o) -> (i, f, o, g)."""
    *lead, g4 = w.shape
    H = g4 // 4
    w4 = w.reshape(*lead, 4, H)
    return jnp.concatenate(
        [w4[..., 0, :], w4[..., 1, :], w4[..., 3, :], w4[..., 2, :]], axis=-1
    )


@jax.jit
def lstm_model_forward(x, params):
    """x: [B, T, F] float32 (batch_first, like the PyTorch module)."""
    B, T, F = x.shape
    H = params["w_hh"].shape[0]          # w_hh: [H, 4H]

    # Offline gate permutation (i,f,g,o) -> (i,f,o,g).
    w_ih = _permute_gates_last_dim(params["w_ih"])     # [F, 4H]
    w_hh = _permute_gates_last_dim(params["w_hh"])     # [H, 4H]
    b = _permute_gates_last_dim(params["b"])           # [1, 4H]

    # Hoisted, fully parallel input projection; produced time-major so the
    # kernel indexes gates_x[t] as a contiguous [B, 4H] tile.
    gates_x = jnp.einsum("btf,fg->tbg", x, w_ih) + b   # [T, B, 4H]

    vmem = pl.BlockSpec(memory_space=pltpu.MemorySpace.VMEM)
    pred = pl.pallas_call(
        _lstm_fc_kernel,
        out_shape=jax.ShapeDtypeStruct((B, 1), jnp.float32),
        in_specs=[vmem] * 4,
        out_specs=vmem,
    )(
        gates_x,
        w_hh,                # [H, 4H]
        params["w_fc"],      # [1, H]
        params["b_fc"],      # [1, 1]
    )
    return pred


def init_params(key, input_size, hidden_size):
    """Deterministic parameter init mirroring nn.LSTM / nn.Linear shapes.

    PyTorch stores weight_ih_l0 [4H, F], weight_hh_l0 [4H, H], fc.weight [1, H];
    we keep the LSTM weights pre-transposed for x @ W style matmuls.
    Gate order here is the PyTorch order (i, f, g, o); the wrapper permutes.
    """
    ks = jax.random.split(key, 6)
    bound = 1.0 / jnp.sqrt(hidden_size)
    u = lambda k, shape: jax.random.uniform(k, shape, jnp.float32, -bound, bound)
    w_ih = u(ks[0], (4 * hidden_size, input_size))     # torch layout
    w_hh = u(ks[1], (4 * hidden_size, hidden_size))
    b_ih = u(ks[2], (4 * hidden_size,))
    b_hh = u(ks[3], (4 * hidden_size,))
    w_fc = u(ks[4], (1, hidden_size))
    b_fc = u(ks[5], (1,))
    return {
        "w_ih": jnp.transpose(w_ih),                   # [F, 4H]
        "w_hh": jnp.transpose(w_hh),                   # [H, 4H]
        "b": (b_ih + b_hh).reshape(1, 4 * hidden_size),
        "w_fc": w_fc,                                  # [1, H] (torch layout)
        "b_fc": b_fc.reshape(1, 1),
    }


def reference_forward(x, params):
    """Pure-JAX reference of the same forward pass (PyTorch gate order)."""
    B, T, F = x.shape
    H = params["w_hh"].shape[0]
    h = jnp.zeros((B, H), jnp.float32)
    c = jnp.zeros((B, H), jnp.float32)
    for t in range(T):
        gates = x[:, t, :] @ params["w_ih"] + h @ params["w_hh"] + params["b"]
        i_g = jax.nn.sigmoid(gates[:, 0 * H:1 * H])
        f_g = jax.nn.sigmoid(gates[:, 1 * H:2 * H])
        g_g = jnp.tanh(gates[:, 2 * H:3 * H])
        o_g = jax.nn.sigmoid(gates[:, 3 * H:4 * H])
        c = f_g * c + i_g * g_g
        h = o_g * jnp.tanh(c)
    return h @ params["w_fc"].T + params["b_fc"]


if __name__ == "__main__":
    BATCH, SEQ, FEAT, HIDDEN = 2, 8, 6, 32

    key = jax.random.PRNGKey(0)
    kx, kp = jax.random.split(key)
    x = jax.random.normal(kx, (BATCH, SEQ, FEAT), dtype=jnp.float32)
    params = init_params(kp, FEAT, HIDDEN)

    pred = lstm_model_forward(x, params)
    pred = jax.block_until_ready(pred)

    ref = reference_forward(x, params)
    assert pred.shape == (BATCH, 1)
    assert jnp.allclose(pred, ref, atol=1e-5, rtol=1e-5), (pred, ref)

    print("KERNEL_OK")
</pallas_src>

<mosaic_0001>
module attributes {stable_mosaic.version = 11 : i64} {
  func.func @_lstm_fc_kernel(%arg0: memref<8x2x128xf32, #tpu.memory_space<vmem>>, %arg1: memref<32x128xf32, #tpu.memory_space<vmem>>, %arg2: memref<1x32xf32, #tpu.memory_space<vmem>>, %arg3: memref<1x1xf32, #tpu.memory_space<vmem>>, %arg4: memref<2x1xf32, #tpu.memory_space<vmem>>) attributes {dimension_semantics = [], scalar_prefetch = 0 : i64, scratch_operands = 0 : i64, tpu.core_type = #tpu.core_type<tc>} {
    %cst = arith.constant 0.000000e+00 : f32
    %0 = vector.broadcast %cst : f32 to vector<2x32xf32>
    %cst_0 = arith.constant 0.000000e+00 : f32
    %1 = vector.broadcast %cst_0 : f32 to vector<2x32xf32>
    %c0_i32 = arith.constant 0 : i32
    %c0 = arith.constant 0 : index
    %c0_1 = arith.constant 0 : index
    %2 = vector.load %arg1[%c0, %c0_1] : memref<32x128xf32, #tpu.memory_space<vmem>>, vector<32x128xf32>
    %cst_2 = arith.constant dense<0.000000e+00> : vector<2x128xf32>
    %3 = tpu.matmul %0, %2, %cst_2 {dimension_numbers = #tpu.dot_dimension_numbers<[1], [0], [0], [1], [0, 0, 1, 1], [], []>} : vector<2x32xf32>, vector<32x128xf32>, vector<2x128xf32> -> vector<2x128xf32>
    %4 = arith.index_cast %c0_i32 : i32 to index
    %c0_3 = arith.constant 0 : index
    %c0_4 = arith.constant 0 : index
    %5 = vector.load %arg0[%4, %c0_3, %c0_4] : memref<8x2x128xf32, #tpu.memory_space<vmem>>, vector<1x2x128xf32>
    %6 = vector.shape_cast %5 : vector<1x2x128xf32> to vector<2x128xf32>
    %7 = arith.addf %3, %6 : vector<2x128xf32>
    %8 = vector.extract_strided_slice %7 {offsets = [0, 0], sizes = [2, 96], strides = [1, 1]} : vector<2x128xf32> to vector<2x96xf32>
    %9 = arith.negf %8 : vector<2x96xf32>
    %10 = math.exp %9 : vector<2x96xf32>
    %cst_5 = arith.constant 1.000000e+00 : f32
    %11 = vector.broadcast %cst_5 : f32 to vector<2x96xf32>
    %12 = arith.addf %11, %10 : vector<2x96xf32>
    %13 = arith.divf %11, %12 : vector<2x96xf32>
    %14 = vector.extract_strided_slice %7 {offsets = [0, 96], sizes = [2, 32], strides = [1, 1]} : vector<2x128xf32> to vector<2x32xf32>
    %15 = math.tanh %14 : vector<2x32xf32>
    %16 = vector.extract_strided_slice %13 {offsets = [0, 0], sizes = [2, 32], strides = [1, 1]} : vector<2x96xf32> to vector<2x32xf32>
    %17 = vector.extract_strided_slice %13 {offsets = [0, 32], sizes = [2, 32], strides = [1, 1]} : vector<2x96xf32> to vector<2x32xf32>
    %18 = vector.extract_strided_slice %13 {offsets = [0, 64], sizes = [2, 32], strides = [1, 1]} : vector<2x96xf32> to vector<2x32xf32>
    %19 = arith.mulf %17, %1 : vector<2x32xf32>
    %20 = arith.mulf %16, %15 : vector<2x32xf32>
    %21 = arith.addf %19, %20 : vector<2x32xf32>
    %22 = math.tanh %21 : vector<2x32xf32>
    %23 = arith.mulf %18, %22 : vector<2x32xf32>
    %c1_i32 = arith.constant 1 : i32
    %c0_6 = arith.constant 0 : index
    %c0_7 = arith.constant 0 : index
    %24 = vector.load %arg1[%c0_6, %c0_7] : memref<32x128xf32, #tpu.memory_space<vmem>>, vector<32x128xf32>
    %cst_8 = arith.constant dense<0.000000e+00> : vector<2x128xf32>
    %25 = tpu.matmul %23, %24, %cst_8 {dimension_numbers = #tpu.dot_dimension_numbers<[1], [0], [0], [1], [0, 0, 1, 1], [], []>} : vector<2x32xf32>, vector<32x128xf32>, vector<2x128xf32> -> vector<2x128xf32>
    %26 = arith.index_cast %c1_i32 : i32 to index
    %c0_9 = arith.constant 0 : index
    %c0_10 = arith.constant 0 : index
    %27 = vector.load %arg0[%26, %c0_9, %c0_10] : memref<8x2x128xf32, #tpu.memory_space<vmem>>, vector<1x2x128xf32>
    %28 = vector.shape_cast %27 : vector<1x2x128xf32> to vector<2x128xf32>
    %29 = arith.addf %25, %28 : vector<2x128xf32>
    %30 = vector.extract_strided_slice %29 {offsets = [0, 0], sizes = [2, 96], strides = [1, 1]} : vector<2x128xf32> to vector<2x96xf32>
    %31 = arith.negf %30 : vector<2x96xf32>
    %32 = math.exp %31 : vector<2x96xf32>
    %cst_11 = arith.constant 1.000000e+00 : f32
    %33 = vector.broadcast %cst_11 : f32 to vector<2x96xf32>
    %34 = arith.addf %33, %32 : vector<2x96xf32>
    %35 = arith.divf %33, %34 : vector<2x96xf32>
    %36 = vector.extract_strided_slice %29 {offsets = [0, 96], sizes = [2, 32], strides = [1, 1]} : vector<2x128xf32> to vector<2x32xf32>
    %37 = math.tanh %36 : vector<2x32xf32>
    %38 = vector.extract_strided_slice %35 {offsets = [0, 0], sizes = [2, 32], strides = [1, 1]} : vector<2x96xf32> to vector<2x32xf32>
    %39 = vector.extract_strided_slice %35 {offsets = [0, 32], sizes = [2, 32], strides = [1, 1]} : vector<2x96xf32> to vector<2x32xf32>
    %40 = vector.extract_strided_slice %35 {offsets = [0, 64], sizes = [2, 32], strides = [1, 1]} : vector<2x96xf32> to vector<2x32xf32>
    %41 = arith.mulf %39, %21 : vector<2x32xf32>
    %42 = arith.mulf %38, %37 : vector<2x32xf32>
    %43 = arith.addf %41, %42 : vector<2x32xf32>
    %44 = math.tanh %43 : vector<2x32xf32>
    %45 = arith.mulf %40, %44 : vector<2x32xf32>
    %c2_i32 = arith.constant 2 : i32
    %c0_12 = arith.constant 0 : index
    %c0_13 = arith.constant 0 : index
    %46 = vector.load %arg1[%c0_12, %c0_13] : memref<32x128xf32, #tpu.memory_space<vmem>>, vector<32x128xf32>
    %cst_14 = arith.constant dense<0.000000e+00> : vector<2x128xf32>
    %47 = tpu.matmul %45, %46, %cst_14 {dimension_numbers = #tpu.dot_dimension_numbers<[1], [0], [0], [1], [0, 0, 1, 1], [], []>} : vector<2x32xf32>, vector<32x128xf32>, vector<2x128xf32> -> vector<2x128xf32>
    %48 = arith.index_cast %c2_i32 : i32 to index
    %c0_15 = arith.constant 0 : index
    %c0_16 = arith.constant 0 : index
    %49 = vector.load %arg0[%48, %c0_15, %c0_16] : memref<8x2x128xf32, #tpu.memory_space<vmem>>, vector<1x2x128xf32>
    %50 = vector.shape_cast %49 : vector<1x2x128xf32> to vector<2x128xf32>
    %51 = arith.addf %47, %50 : vector<2x128xf32>
    %52 = vector.extract_strided_slice %51 {offsets = [0, 0], sizes = [2, 96], strides = [1, 1]} : vector<2x128xf32> to vector<2x96xf32>
    %53 = arith.negf %52 : vector<2x96xf32>
    %54 = math.exp %53 : vector<2x96xf32>
    %cst_17 = arith.constant 1.000000e+00 : f32
    %55 = vector.broadcast %cst_17 : f32 to vector<2x96xf32>
    %56 = arith.addf %55, %54 : vector<2x96xf32>
    %57 = arith.divf %55, %56 : vector<2x96xf32>
    %58 = vector.extract_strided_slice %51 {offsets = [0, 96], sizes = [2, 32], strides = [1, 1]} : vector<2x128xf32> to vector<2x32xf32>
    %59 = math.tanh %58 : vector<2x32xf32>
    %60 = vector.extract_strided_slice %57 {offsets = [0, 0], sizes = [2, 32], strides = [1, 1]} : vector<2x96xf32> to vector<2x32xf32>
    %61 = vector.extract_strided_slice %57 {offsets = [0, 32], sizes = [2, 32], strides = [1, 1]} : vector<2x96xf32> to vector<2x32xf32>
    %62 = vector.extract_strided_slice %57 {offsets = [0, 64], sizes = [2, 32], strides = [1, 1]} : vector<2x96xf32> to vector<2x32xf32>
    %63 = arith.mulf %61, %43 : vector<2x32xf32>
    %64 = arith.mulf %60, %59 : vector<2x32xf32>
    %65 = arith.addf %63, %64 : vector<2x32xf32>
    %66 = math.tanh %65 : vector<2x32xf32>
    %67 = arith.mulf %62, %66 : vector<2x32xf32>
    %c3_i32 = arith.constant 3 : i32
    %c0_18 = arith.constant 0 : index
    %c0_19 = arith.constant 0 : index
    %68 = vector.load %arg1[%c0_18, %c0_19] : memref<32x128xf32, #tpu.memory_space<vmem>>, vector<32x128xf32>
    %cst_20 = arith.constant dense<0.000000e+00> : vector<2x128xf32>
    %69 = tpu.matmul %67, %68, %cst_20 {dimension_numbers = #tpu.dot_dimension_numbers<[1], [0], [0], [1], [0, 0, 1, 1], [], []>} : vector<2x32xf32>, vector<32x128xf32>, vector<2x128xf32> -> vector<2x128xf32>
    %70 = arith.index_cast %c3_i32 : i32 to index
    %c0_21 = arith.constant 0 : index
    %c0_22 = arith.constant 0 : index
    %71 = vector.load %arg0[%70, %c0_21, %c0_22] : memref<8x2x128xf32, #tpu.memory_space<vmem>>, vector<1x2x128xf32>
    %72 = vector.shape_cast %71 : vector<1x2x128xf32> to vector<2x128xf32>
    %73 = arith.addf %69, %72 : vector<2x128xf32>
    %74 = vector.extract_strided_slice %73 {offsets = [0, 0], sizes = [2, 96], strides = [1, 1]} : vector<2x128xf32> to vector<2x96xf32>
    %75 = arith.negf %74 : vector<2x96xf32>
    %76 = math.exp %75 : vector<2x96xf32>
    %cst_23 = arith.constant 1.000000e+00 : f32
    %77 = vector.broadcast %cst_23 : f32 to vector<2x96xf32>
    %78 = arith.addf %77, %76 : vector<2x96xf32>
    %79 = arith.divf %77, %78 : vector<2x96xf32>
    %80 = vector.extract_strided_slice %73 {offsets = [0, 96], sizes = [2, 32], strides = [1, 1]} : vector<2x128xf32> to vector<2x32xf32>
    %81 = math.tanh %80 : vector<2x32xf32>
    %82 = vector.extract_strided_slice %79 {offsets = [0, 0], sizes = [2, 32], strides = [1, 1]} : vector<2x96xf32> to vector<2x32xf32>
    %83 = vector.extract_strided_slice %79 {offsets = [0, 32], sizes = [2, 32], strides = [1, 1]} : vector<2x96xf32> to vector<2x32xf32>
    %84 = vector.extract_strided_slice %79 {offsets = [0, 64], sizes = [2, 32], strides = [1, 1]} : vector<2x96xf32> to vector<2x32xf32>
    %85 = arith.mulf %83, %65 : vector<2x32xf32>
    %86 = arith.mulf %82, %81 : vector<2x32xf32>
    %87 = arith.addf %85, %86 : vector<2x32xf32>
    %88 = math.tanh %87 : vector<2x32xf32>
    %89 = arith.mulf %84, %88 : vector<2x32xf32>
    %c4_i32 = arith.constant 4 : i32
    %c0_24 = arith.constant 0 : index
    %c0_25 = arith.constant 0 : index
    %90 = vector.load %arg1[%c0_24, %c0_25] : memref<32x128xf32, #tpu.memory_space<vmem>>, vector<32x128xf32>
    %cst_26 = arith.constant dense<0.000000e+00> : vector<2x128xf32>
    %91 = tpu.matmul %89, %90, %cst_26 {dimension_numbers = #tpu.dot_dimension_numbers<[1], [0], [0], [1], [0, 0, 1, 1], [], []>} : vector<2x32xf32>, vector<32x128xf32>, vector<2x128xf32> -> vector<2x128xf32>
    %92 = arith.index_cast %c4_i32 : i32 to index
    %c0_27 = arith.constant 0 : index
    %c0_28 = arith.constant 0 : index
    %93 = vector.load %arg0[%92, %c0_27, %c0_28] : memref<8x2x128xf32, #tpu.memory_space<vmem>>, vector<1x2x128xf32>
    %94 = vector.shape_cast %93 : vector<1x2x128xf32> to vector<2x128xf32>
    %95 = arith.addf %91, %94 : vector<2x128xf32>
    %96 = vector.extract_strided_slice %95 {offsets = [0, 0], sizes = [2, 96], strides = [1, 1]} : vector<2x128xf32> to vector<2x96xf32>
    %97 = arith.negf %96 : vector<2x96xf32>
    %98 = math.exp %97 : vector<2x96xf32>
    %cst_29 = arith.constant 1.000000e+00 : f32
    %99 = vector.broadcast %cst_29 : f32 to vector<2x96xf32>
    %100 = arith.addf %99, %98 : vector<2x96xf32>
    %101 = arith.divf %99, %100 : vector<2x96xf32>
    %102 = vector.extract_strided_slice %95 {offsets = [0, 96], sizes = [2, 32], strides = [1, 1]} : vector<2x128xf32> to vector<2x32xf32>
    %103 = math.tanh %102 : vector<2x32xf32>
    %104 = vector.extract_strided_slice %101 {offsets = [0, 0], sizes = [2, 32], strides = [1, 1]} : vector<2x96xf32> to vector<2x32xf32>
    %105 = vector.extract_strided_slice %101 {offsets = [0, 32], sizes = [2, 32], strides = [1, 1]} : vector<2x96xf32> to vector<2x32xf32>
    %106 = vector.extract_strided_slice %101 {offsets = [0, 64], sizes = [2, 32], strides = [1, 1]} : vector<2x96xf32> to vector<2x32xf32>
    %107 = arith.mulf %105, %87 : vector<2x32xf32>
    %108 = arith.mulf %104, %103 : vector<2x32xf32>
    %109 = arith.addf %107, %108 : vector<2x32xf32>
    %110 = math.tanh %109 : vector<2x32xf32>
    %111 = arith.mulf %106, %110 : vector<2x32xf32>
    %c5_i32 = arith.constant 5 : i32
    %c0_30 = arith.constant 0 : index
    %c0_31 = arith.constant 0 : index
    %112 = vector.load %arg1[%c0_30, %c0_31] : memref<32x128xf32, #tpu.memory_space<vmem>>, vector<32x128xf32>
    %cst_32 = arith.constant dense<0.000000e+00> : vector<2x128xf32>
    %113 = tpu.matmul %111, %112, %cst_32 {dimension_numbers = #tpu.dot_dimension_numbers<[1], [0], [0], [1], [0, 0, 1, 1], [], []>} : vector<2x32xf32>, vector<32x128xf32>, vector<2x128xf32> -> vector<2x128xf32>
    %114 = arith.index_cast %c5_i32 : i32 to index
    %c0_33 = arith.constant 0 : index
    %c0_34 = arith.constant 0 : index
    %115 = vector.load %arg0[%114, %c0_33, %c0_34] : memref<8x2x128xf32, #tpu.memory_space<vmem>>, vector<1x2x128xf32>
    %116 = vector.shape_cast %115 : vector<1x2x128xf32> to vector<2x128xf32>
    %117 = arith.addf %113, %116 : vector<2x128xf32>
    %118 = vector.extract_strided_slice %117 {offsets = [0, 0], sizes = [2, 96], strides = [1, 1]} : vector<2x128xf32> to vector<2x96xf32>
    %119 = arith.negf %118 : vector<2x96xf32>
    %120 = math.exp %119 : vector<2x96xf32>
    %cst_35 = arith.constant 1.000000e+00 : f32
    %121 = vector.broadcast %cst_35 : f32 to vector<2x96xf32>
    %122 = arith.addf %121, %120 : vector<2x96xf32>
    %123 = arith.divf %121, %122 : vector<2x96xf32>
    %124 = vector.extract_strided_slice %117 {offsets = [0, 96], sizes = [2, 32], strides = [1, 1]} : vector<2x128xf32> to vector<2x32xf32>
    %125 = math.tanh %124 : vector<2x32xf32>
    %126 = vector.extract_strided_slice %123 {offsets = [0, 0], sizes = [2, 32], strides = [1, 1]} : vector<2x96xf32> to vector<2x32xf32>
    %127 = vector.extract_strided_slice %123 {offsets = [0, 32], sizes = [2, 32], strides = [1, 1]} : vector<2x96xf32> to vector<2x32xf32>
    %128 = vector.extract_strided_slice %123 {offsets = [0, 64], sizes = [2, 32], strides = [1, 1]} : vector<2x96xf32> to vector<2x32xf32>
    %129 = arith.mulf %127, %109 : vector<2x32xf32>
    %130 = arith.mulf %126, %125 : vector<2x32xf32>
    %131 = arith.addf %129, %130 : vector<2x32xf32>
    %132 = math.tanh %131 : vector<2x32xf32>
    %133 = arith.mulf %128, %132 : vector<2x32xf32>
    %c6_i32 = arith.constant 6 : i32
    %c0_36 = arith.constant 0 : index
    %c0_37 = arith.constant 0 : index
    %134 = vector.load %arg1[%c0_36, %c0_37] : memref<32x128xf32, #tpu.memory_space<vmem>>, vector<32x128xf32>
    %cst_38 = arith.constant dense<0.000000e+00> : vector<2x128xf32>
    %135 = tpu.matmul %133, %134, %cst_38 {dimension_numbers = #tpu.dot_dimension_numbers<[1], [0], [0], [1], [0, 0, 1, 1], [], []>} : vector<2x32xf32>, vector<32x128xf32>, vector<2x128xf32> -> vector<2x128xf32>
    %136 = arith.index_cast %c6_i32 : i32 to index
    %c0_39 = arith.constant 0 : index
    %c0_40 = arith.constant 0 : index
    %137 = vector.load %arg0[%136, %c0_39, %c0_40] : memref<8x2x128xf32, #tpu.memory_space<vmem>>, vector<1x2x128xf32>
    %138 = vector.shape_cast %137 : vector<1x2x128xf32> to vector<2x128xf32>
    %139 = arith.addf %135, %138 : vector<2x128xf32>
    %140 = vector.extract_strided_slice %139 {offsets = [0, 0], sizes = [2, 96], strides = [1, 1]} : vector<2x128xf32> to vector<2x96xf32>
    %141 = arith.negf %140 : vector<2x96xf32>
    %142 = math.exp %141 : vector<2x96xf32>
    %cst_41 = arith.constant 1.000000e+00 : f32
    %143 = vector.broadcast %cst_41 : f32 to vector<2x96xf32>
    %144 = arith.addf %143, %142 : vector<2x96xf32>
    %145 = arith.divf %143, %144 : vector<2x96xf32>
    %146 = vector.extract_strided_slice %139 {offsets = [0, 96], sizes = [2, 32], strides = [1, 1]} : vector<2x128xf32> to vector<2x32xf32>
    %147 = math.tanh %146 : vector<2x32xf32>
    %148 = vector.extract_strided_slice %145 {offsets = [0, 0], sizes = [2, 32], strides = [1, 1]} : vector<2x96xf32> to vector<2x32xf32>
    %149 = vector.extract_strided_slice %145 {offsets = [0, 32], sizes = [2, 32], strides = [1, 1]} : vector<2x96xf32> to vector<2x32xf32>
    %150 = vector.extract_strided_slice %145 {offsets = [0, 64], sizes = [2, 32], strides = [1, 1]} : vector<2x96xf32> to vector<2x32xf32>
    %151 = arith.mulf %149, %131 : vector<2x32xf32>
    %152 = arith.mulf %148, %147 : vector<2x32xf32>
    %153 = arith.addf %151, %152 : vector<2x32xf32>
    %154 = math.tanh %153 : vector<2x32xf32>
    %155 = arith.mulf %150, %154 : vector<2x32xf32>
    %c7_i32 = arith.constant 7 : i32
    %c0_42 = arith.constant 0 : index
    %c0_43 = arith.constant 0 : index
    %156 = vector.load %arg1[%c0_42, %c0_43] : memref<32x128xf32, #tpu.memory_space<vmem>>, vector<32x128xf32>
    %cst_44 = arith.constant dense<0.000000e+00> : vector<2x128xf32>
    %157 = tpu.matmul %155, %156, %cst_44 {dimension_numbers = #tpu.dot_dimension_numbers<[1], [0], [0], [1], [0, 0, 1, 1], [], []>} : vector<2x32xf32>, vector<32x128xf32>, vector<2x128xf32> -> vector<2x128xf32>
    %158 = arith.index_cast %c7_i32 : i32 to index
    %c0_45 = arith.constant 0 : index
    %c0_46 = arith.constant 0 : index
    %159 = vector.load %arg0[%158, %c0_45, %c0_46] : memref<8x2x128xf32, #tpu.memory_space<vmem>>, vector<1x2x128xf32>
    %160 = vector.shape_cast %159 : vector<1x2x128xf32> to vector<2x128xf32>
    %161 = arith.addf %157, %160 : vector<2x128xf32>
    %162 = vector.extract_strided_slice %161 {offsets = [0, 0], sizes = [2, 96], strides = [1, 1]} : vector<2x128xf32> to vector<2x96xf32>
    %163 = arith.negf %162 : vector<2x96xf32>
    %164 = math.exp %163 : vector<2x96xf32>
    %cst_47 = arith.constant 1.000000e+00 : f32
    %165 = vector.broadcast %cst_47 : f32 to vector<2x96xf32>
    %166 = arith.addf %165, %164 : vector<2x96xf32>
    %167 = arith.divf %165, %166 : vector<2x96xf32>
    %168 = vector.extract_strided_slice %161 {offsets = [0, 96], sizes = [2, 32], strides = [1, 1]} : vector<2x128xf32> to vector<2x32xf32>
    %169 = math.tanh %168 : vector<2x32xf32>
    %170 = vector.extract_strided_slice %167 {offsets = [0, 0], sizes = [2, 32], strides = [1, 1]} : vector<2x96xf32> to vector<2x32xf32>
    %171 = vector.extract_strided_slice %167 {offsets = [0, 32], sizes = [2, 32], strides = [1, 1]} : vector<2x96xf32> to vector<2x32xf32>
    %172 = vector.extract_strided_slice %167 {offsets = [0, 64], sizes = [2, 32], strides = [1, 1]} : vector<2x96xf32> to vector<2x32xf32>
    %173 = arith.mulf %171, %153 : vector<2x32xf32>
    %174 = arith.mulf %170, %169 : vector<2x32xf32>
    %175 = arith.addf %173, %174 : vector<2x32xf32>
    %176 = math.tanh %175 : vector<2x32xf32>
    %177 = arith.mulf %172, %176 : vector<2x32xf32>
    %c8_i32 = arith.constant 8 : i32
    %c0_48 = arith.constant 0 : index
    %c0_49 = arith.constant 0 : index
    %178 = vector.load %arg2[%c0_48, %c0_49] : memref<1x32xf32, #tpu.memory_space<vmem>>, vector<1x32xf32>
    %179 = vector.broadcast %178 : vector<1x32xf32> to vector<2x32xf32>
    %180 = arith.mulf %177, %179 : vector<2x32xf32>
    %cst_50 = arith.constant dense<0.000000e+00> : vector<2xf32>
    %181 = vector.multi_reduction <add>, %180, %cst_50 [1] : vector<2x32xf32> to vector<2xf32>
    %182 = vector.shape_cast %181 : vector<2xf32> to vector<2x1xf32>
    %c0_51 = arith.constant 0 : index
    %c0_52 = arith.constant 0 : index
    %183 = vector.load %arg3[%c0_51, %c0_52] : memref<1x1xf32, #tpu.memory_space<vmem>>, vector<1x1xf32>
    %184 = vector.broadcast %183 : vector<1x1xf32> to vector<2x1xf32>
    %185 = arith.addf %182, %184 : vector<2x1xf32>
    %c0_53 = arith.constant 0 : index
    %c0_54 = arith.constant 0 : index
    %186 = vector.load %arg4[%c0_53, %c0_54] : memref<2x1xf32, #tpu.memory_space<vmem>>, vector<2x1xf32>
    tpu.vector_store %arg4[%c0_53, %c0_54], %185 {strides = array<i32>} : memref<2x1xf32, #tpu.memory_space<vmem>>, vector<2x1xf32>,
    return
  }
}

</mosaic_0001>

<bundles_post_ra>
// kernel: lstm_model_forward.1
= control target key start
LH: loop header
LB: loop body
LE: loop exit
PB: predicated region body
PF: predicated region fallthrough
CT: control target
= control target key end

     0   :  { %v650_v4 = vmov 0.0   ;;  %s651_s24 = smov 32   ;;  %s652_s25 = smov 64   ;;  %vm24_vm4 = vcmask 261120   ;;  %s763_s1 = inlined_call_operand.vmem [shape: f32[32,128], index: 1, kind: input, shape index: {}]   ;;  %s764_s0 = inlined_call_operand.vmem [shape: f32[8,2,128], index: 0, kind: input, shape index: {}]   ;;  %s765_s2 = inlined_call_operand.vmem [shape: f32[1,32], index: 2, kind: input, shape index: {}]   ;;  %s766_s3 = inlined_call_operand.<no memory space> [shape: f32[1,1], index: 3, kind: input, shape index: {}]   ;;  %s767_s4 = inlined_call_operand.vmem [shape: f32[2,1], index: 4, kind: output, shape index: {}]  }
   0x1   :  { %v22_v0 = vld [vmem:[%s763_s1 + $0x18] sm:$0xff]  ;;  %v21_v1 = vld [vmem:[%s763_s1 + $0x10] sm:$0xff]  ;;  %v20_v2 = vld [vmem:[%s763_s1 + $0x8] sm:$0xff] }
   0x2   :  { %40 = vmatpush.msra.mxu0 %v22_v0  ;;  %104 = vmatpush.msra.mxu1 %v22_v0  ;;  %v19_v3 = vld [vmem:[%s763_s1] sm:$0xff] }
   0x3   :  { %168 = vmatpush.msra.mxu2 %v22_v0  ;;  %232 = vmatpush.msra.mxu3 %v22_v0  ;;  %v23_v5 = vld [vmem:[%s764_s0] sm:$0x3]  ;;  %v560_v31 = vld [vmem:[%s764_s0 + $0x2] sm:$0x3]  ;;  %v563_v57 = vld [vmem:[%s764_s0 + $0x4] sm:$0x3] }
   0x4   :  { %41 = vmatpush.msra.mxu0 %v21_v1  ;;  %105 = vmatpush.msra.mxu1 %v21_v1 }
   0x5   :  { %169 = vmatpush.msra.mxu2 %v21_v1  ;;  %233 = vmatpush.msra.mxu3 %v21_v1 }
   0x6   :  { %42 = vmatpush.msra.mxu0 %v20_v2  ;;  %106 = vmatpush.msra.mxu1 %v20_v2 }
   0x7   :  { %170 = vmatpush.msra.mxu2 %v20_v2  ;;  %234 = vmatpush.msra.mxu3 %v20_v2 }
   0x8   :  { %43 = vmatpush.msra.mxu0 %v19_v3  ;;  %107 = vmatpush.msra.mxu1 %v19_v3 }
   0x9   :  { %44 = vmatmul.f32.vlgmr.msra.gmra.mxu0 %v650_v4  ;;  %171 = vmatpush.msra.mxu2 %v19_v3 }
   0xa   :  { %235 = vmatpush.msra.mxu3 %v19_v3  ;;  %296 = vmatpush.msrb.mxu0 %v22_v0 }
   0xb   :  { %360 = vmatpush.msrb.mxu1 %v22_v0  ;;  %424 = vmatpush.msrb.mxu2 %v22_v0 }
   0xc   :  { %297 = vmatpush.msrb.mxu0 %v21_v1  ;;  %488 = vmatpush.msrb.mxu3 %v22_v0 }
   0xd   :  { %361 = vmatpush.msrb.mxu1 %v21_v1  ;;  %425 = vmatpush.msrb.mxu2 %v21_v1 }
   0xe   :  { %298 = vmatpush.msrb.mxu0 %v20_v2  ;;  %489 = vmatpush.msrb.mxu3 %v21_v1 }
   0xf   :  { %362 = vmatpush.msrb.mxu1 %v20_v2  ;;  %426 = vmatpush.msrb.mxu2 %v20_v2 }
  0x10   :  { %299 = vmatpush.msrb.mxu0 %v19_v3  ;;  %490 = vmatpush.msrb.mxu3 %v20_v2 }
  0x11   :  { %363 = vmatpush.msrb.mxu1 %v19_v3  ;;  %427 = vmatpush.msrb.mxu2 %v19_v3 }
  0x12   :  { %491 = vmatpush.msrb.mxu3 %v19_v3 }
  0x86   :  { %v45_v6 = vpop.f32.mrf.mxu0 }
  0x87   :  { %v46_v7 = vadd.f32 %v45_v6, %v23_v5 }
  0x89   :  { %586 = vtanh.f32 %v46_v7  ;;  %v559_v9 = vmul.f32 -1.442695, %v46_v7 }
  0x8b   :  { %588 = vpow2.f32 %v559_v9 }
  0x8f   :  { %v587_v8 = vpop.eup %586 }
  0x90   :  { %70 = vrot.lane.b32.xlu0 %v587_v8, %s651_s24 }
  0x91   :  { %v589_v10 = vpop.eup %588 }
  0x92   :  { %v51_v11 = vadd.f32 1.0, %v589_v10 }
  0x94   :  { %590 = vrcp.f32 %v51_v11  ;;  %v63_v17 = vand.u32 2147483648, %v51_v11  ;;  %vm57_vm1 = vweird.f32 %v51_v11  ;;  %v61_v18 = vand.u32 2147483647, %v51_v11 }
  0x96   :  { %v64_v20 = vor.u32 1.1754944e-38, %v63_v17  ;;  %vm62_vm3 = vcmp.eq.f32.partialorder %v61_v18, 8.507059e+37 }
  0x9a   :  { %v591_v12 = vpop.eup %590 }
  0x9b   :  { %v53_v13 = vmul.f32 %v591_v12, %v51_v11  ;;  %vm58_vm0 = vweird.f32 %v591_v12 }
  0x9c   :  { %vm59_vm2 = vmor %vm57_vm1, %vm58_vm0 }
  0x9d   :  { %v54_v14 = vsub.f32 1.0, %v53_v13 }
  0x9f   :  { %v55_v15 = vmul.f32 %v591_v12, %v54_v14 }
  0xa1   :  { %v56_v16 = vadd.f32 %v591_v12, %v55_v15 }
  0xa3   :  { %v60_v19 = vsel %vm59_vm2, %v591_v12, %v56_v16 }
  0xa4   :  { %v65_v22 = vsel %vm62_vm3, %v64_v20, %v60_v19  ;;  %v566_v19 = vld [vmem:[%s764_s0 + $0x6] sm:$0x3] }
  0xa5   :  { %v68_v24 = vmul.f32 0.0, %v65_v22 }
 0x102   :  { %v71_v21 = vpop.permute.xlu0 %70 }
 0x103   :  { %v73_v23 = vmul.f32 %v71_v21, %v65_v22 }
 0x105   :  { %75 = vrot.lane.b32.xlu0 %v73_v23, %s651_s24 }
 0x177   :  { %v76_v25 = vpop.permute.xlu0 %75 }
 0x178   :  { %v78_v26 = vadd.f32 %v76_v25, %v68_v24 }
 0x17a   :  { %592 = vtanh.f32 %v78_v26 }
 0x180   :  { %v593_v27 = vpop.eup %592 }
 0x181   :  { %81 = vrot.lane.b32.xlu1 %v593_v27, %s651_s24 }
 0x1f3   :  { %v82_v28 = vpop.permute.xlu1 %81 }
 0x1f4   :  { %v84_v29 = vmul.f32 %v82_v28, %v65_v22 }
 0x1f6   :  { %88 = vrot.lane.b32.xlu1 %v84_v29, %s652_s25 }
 0x268   :  { %v89_v30 = vpop.permute.xlu1 %88 }
 0x269   :  { %561 = vmatmul.msk.f32.vlgmr.msra.gmra.mxu1 %vm24_vm4, %v89_v30 }
 0x2e6   :  { %v109_v32 = vpop.f32.mrf.mxu1 }
 0x2e7   :  { %v110_v33 = vadd.f32 %v560_v31, %v109_v32 }
 0x2e9   :  { %594 = vtanh.f32 %v110_v33  ;;  %v562_v35 = vmul.f32 -1.442695, %v110_v33 }
 0x2eb   :  { %596 = vpow2.f32 %v562_v35 }
 0x2ef   :  { %v595_v34 = vpop.eup %594 }
 0x2f0   :  { %134 = vrot.lane.b32.xlu2 %v595_v34, %s651_s24 }
 0x2f1   :  { %v597_v36 = vpop.eup %596 }
 0x2f2   :  { %v115_v37 = vadd.f32 1.0, %v597_v36 }
 0x2f4   :  { %598 = vrcp.f32 %v115_v37  ;;  %v127_v43 = vand.u32 2147483648, %v115_v37  ;;  %vm121_vm6 = vweird.f32 %v115_v37  ;;  %v125_v44 = vand.u32 2147483647, %v115_v37 }
 0x2f6   :  { %v128_v46 = vor.u32 1.1754944e-38, %v127_v43  ;;  %vm126_vm8 = vcmp.eq.f32.partialorder %v125_v44, 8.507059e+37 }
 0x2fa   :  { %v599_v38 = vpop.eup %598 }
 0x2fb   :  { %v117_v39 = vmul.f32 %v599_v38, %v115_v37  ;;  %vm122_vm5 = vweird.f32 %v599_v38 }
 0x2fc   :  { %vm123_vm7 = vmor %vm121_vm6, %vm122_vm5 }
 0x2fd   :  { %v118_v40 = vsub.f32 1.0, %v117_v39 }
 0x2ff   :  { %v119_v41 = vmul.f32 %v599_v38, %v118_v40 }
 0x301   :  { %v120_v42 = vadd.f32 %v599_v38, %v119_v41 }
 0x303   :  { %v124_v45 = vsel %vm123_vm7, %v599_v38, %v120_v42 }
 0x304   :  { %v129_v48 = vsel %vm126_vm8, %v128_v46, %v124_v45  ;;  %v569_v45 = vld [vmem:[%s764_s0 + $0x8] sm:$0x3] }
 0x305   :  { %v132_v50 = vmul.f32 %v129_v48, %v78_v26 }
 0x34a   :  { %v135_v47 = vpop.permute.xlu2 %134 }
 0x34b   :  { %v137_v49 = vmul.f32 %v135_v47, %v129_v48 }
 0x34d   :  { %139 = vrot.lane.b32.xlu2 %v137_v49, %s651_s24 }
 0x3a7   :  { %v140_v51 = vpop.permute.xlu2 %139 }
 0x3a8   :  { %v142_v52 = vadd.f32 %v140_v51, %v132_v50 }
 0x3aa   :  { %600 = vtanh.f32 %v142_v52 }
 0x3b0   :  { %v601_v53 = vpop.eup %600 }
 0x3b1   :  { %145 = vrot.lane.b32.xlu0 %v601_v53, %s651_s24 }
 0x423   :  { %v146_v54 = vpop.permute.xlu0 %145 }
 0x424   :  { %v148_v55 = vmul.f32 %v146_v54, %v129_v48 }
 0x426   :  { %152 = vrot.lane.b32.xlu1 %v148_v55, %s652_s25 }
 0x498   :  { %v153_v56 = vpop.permute.xlu1 %152 }
 0x499   :  { %564 = vmatmul.msk.f32.vlgmr.msra.gmra.mxu2 %vm24_vm4, %v153_v56 }
 0x51c   :  { %v173_v58 = vpop.f32.mrf.mxu2 }
 0x51d   :  { %v174_v59 = vadd.f32 %v563_v57, %v173_v58 }
 0x51f   :  { %602 = vtanh.f32 %v174_v59  ;;  %v565_v61 = vmul.f32 -1.442695, %v174_v59 }
 0x521   :  { %604 = vpow2.f32 %v565_v61 }
 0x525   :  { %v603_v60 = vpop.eup %602 }
 0x526   :  { %198 = vrot.lane.b32.xlu2 %v603_v60, %s651_s24 }
 0x527   :  { %v605_v62 = vpop.eup %604 }
 0x528   :  { %v179_v63 = vadd.f32 1.0, %v605_v62 }
 0x52a   :  { %606 = vrcp.f32 %v179_v63  ;;  %v191_v5 = vand.u32 2147483648, %v179_v63  ;;  %vm185_vm10 = vweird.f32 %v179_v63  ;;  %v189_v6 = vand.u32 2147483647, %v179_v63 }
 0x52c   :  { %v192_v8 = vor.u32 1.1754944e-38, %v191_v5  ;;  %vm190_vm12 = vcmp.eq.f32.partialorder %v189_v6, 8.507059e+37 }
 0x530   :  { %v607_v0 = vpop.eup %606 }
 0x531   :  { %v181_v1 = vmul.f32 %v607_v0, %v179_v63  ;;  %vm186_vm9 = vweird.f32 %v607_v0 }
 0x532   :  { %vm187_vm11 = vmor %vm185_vm10, %vm186_vm9 }
 0x533   :  { %v182_v2 = vsub.f32 1.0, %v181_v1 }
 0x535   :  { %v183_v3 = vmul.f32 %v607_v0, %v182_v2 }
 0x537   :  { %v184_v4 = vadd.f32 %v607_v0, %v183_v3 }
 0x539   :  { %v188_v7 = vsel %vm187_vm11, %v607_v0, %v184_v4 }
 0x53a   :  { %v193_v10 = vsel %vm190_vm12, %v192_v8, %v188_v7  ;;  %v572_v7 = vld [vmem:[%s764_s0 + $0xa] sm:$0x3] }
 0x53b   :  { %v196_v12 = vmul.f32 %v193_v10, %v142_v52 }
 0x580   :  { %v199_v9 = vpop.permute.xlu2 %198 }
 0x581   :  { %v201_v11 = vmul.f32 %v199_v9, %v193_v10 }
 0x583   :  { %203 = vrot.lane.b32.xlu0 %v201_v11, %s651_s24 }
 0x5f5   :  { %v204_v13 = vpop.permute.xlu0 %203 }
 0x5f6   :  { %v206_v14 = vadd.f32 %v204_v13, %v196_v12 }
 0x5f8   :  { %608 = vtanh.f32 %v206_v14 }
 0x5fe   :  { %v609_v15 = vpop.eup %608 }
 0x5ff   :  { %209 = vrot.lane.b32.xlu1 %v609_v15, %s651_s24 }
 0x671   :  { %v210_v16 = vpop.permute.xlu1 %209 }
 0x672   :  { %v212_v17 = vmul.f32 %v210_v16, %v193_v10 }
 0x674   :  { %216 = vrot.lane.b32.xlu2 %v212_v17, %s652_s25 }
 0x6ce   :  { %v217_v18 = vpop.permute.xlu2 %216 }
 0x6cf   :  { %567 = vmatmul.msk.f32.vlgmr.msra.gmra.mxu3 %vm24_vm4, %v217_v18 }
 0x752   :  { %v237_v20 = vpop.f32.mrf.mxu3 }
 0x753   :  { %v238_v21 = vadd.f32 %v566_v19, %v237_v20 }
 0x755   :  { %610 = vtanh.f32 %v238_v21  ;;  %v568_v23 = vmul.f32 -1.442695, %v238_v21 }
 0x757   :  { %612 = vpow2.f32 %v568_v23 }
 0x75b   :  { %v611_v22 = vpop.eup %610 }
 0x75c   :  { %262 = vrot.lane.b32.xlu0 %v611_v22, %s651_s24 }
 0x75d   :  { %v613_v24 = vpop.eup %612 }
 0x75e   :  { %v243_v25 = vadd.f32 1.0, %v613_v24 }
 0x760   :  { %614 = vrcp.f32 %v243_v25  ;;  %v255_v31 = vand.u32 2147483648, %v243_v25  ;;  %vm249_vm14 = vweird.f32 %v243_v25  ;;  %v253_v32 = vand.u32 2147483647, %v243_v25 }
 0x762   :  { %v256_v34 = vor.u32 1.1754944e-38, %v255_v31  ;;  %vm254_vm0 = vcmp.eq.f32.partialorder %v253_v32, 8.507059e+37 }
 0x766   :  { %v615_v26 = vpop.eup %614 }
 0x767   :  { %v245_v27 = vmul.f32 %v615_v26, %v243_v25  ;;  %vm250_vm13 = vweird.f32 %v615_v26 }
 0x768   :  { %vm251_vm15 = vmor %vm249_vm14, %vm250_vm13 }
 0x769   :  { %v246_v28 = vsub.f32 1.0, %v245_v27 }
 0x76b   :  { %v247_v29 = vmul.f32 %v615_v26, %v246_v28 }
 0x76d   :  { %v248_v30 = vadd.f32 %v615_v26, %v247_v29 }
 0x76f   :  { %v252_v33 = vsel %vm251_vm15, %v615_v26, %v248_v30 }
 0x770   :  { %v257_v36 = vsel %vm254_vm0, %v256_v34, %v252_v33  ;;  %v575_v33 = vld [vmem:[%s764_s0 + $0xc] sm:$0x3] }
 0x771   :  { %v260_v38 = vmul.f32 %v257_v36, %v206_v14 }
 0x7ce   :  { %v263_v35 = vpop.permute.xlu0 %262 }
 0x7cf   :  { %v265_v37 = vmul.f32 %v263_v35, %v257_v36 }
 0x7d1   :  { %267 = vrot.lane.b32.xlu1 %v265_v37, %s651_s24 }
 0x843   :  { %v268_v39 = vpop.permute.xlu1 %267 }
 0x844   :  { %v270_v40 = vadd.f32 %v268_v39, %v260_v38 }
 0x846   :  { %616 = vtanh.f32 %v270_v40 }
 0x84c   :  { %v617_v41 = vpop.eup %616 }
 0x84d   :  { %273 = vrot.lane.b32.xlu2 %v617_v41, %s651_s24 }
 0x8a7   :  { %v274_v42 = vpop.permute.xlu2 %273 }
 0x8a8   :  { %v276_v43 = vmul.f32 %v274_v42, %v257_v36 }
 0x8aa   :  { %280 = vrot.lane.b32.xlu0 %v276_v43, %s652_s25 }
 0x91c   :  { %v281_v44 = vpop.permute.xlu0 %280 }
 0x91d   :  { %570 = vmatmul.msk.f32.vlgmr.msrb.gmra.mxu0 %vm24_vm4, %v281_v44 }
 0x99a   :  { %v301_v46 = vpop.f32.mrf.mxu0 }
 0x99b   :  { %v302_v47 = vadd.f32 %v569_v45, %v301_v46 }
 0x99d   :  { %618 = vtanh.f32 %v302_v47  ;;  %v571_v49 = vmul.f32 -1.442695, %v302_v47 }
 0x99f   :  { %620 = vpow2.f32 %v571_v49 }
 0x9a3   :  { %v619_v48 = vpop.eup %618 }
 0x9a4   :  { %326 = vrot.lane.b32.xlu1 %v619_v48, %s651_s24 }
 0x9a5   :  { %v621_v50 = vpop.eup %620 }
 0x9a6   :  { %v307_v51 = vadd.f32 1.0, %v621_v50 }
 0x9a8   :  { %622 = vrcp.f32 %v307_v51  ;;  %v319_v57 = vand.u32 2147483648, %v307_v51  ;;  %vm313_vm2 = vweird.f32 %v307_v51  ;;  %v317_v58 = vand.u32 2147483647, %v307_v51 }
 0x9aa   :  { %v320_v60 = vor.u32 1.1754944e-38, %v319_v57  ;;  %vm318_vm5 = vcmp.eq.f32.partialorder %v317_v58, 8.507059e+37 }
 0x9ae   :  { %v623_v52 = vpop.eup %622 }
 0x9af   :  { %v309_v53 = vmul.f32 %v623_v52, %v307_v51  ;;  %vm314_vm1 = vweird.f32 %v623_v52 }
 0x9b0   :  { %vm315_vm3 = vmor %vm313_vm2, %vm314_vm1  ;;  %vm544_vm1 = vcmask 254976   ;;  %vm553_vm2 = vcmask 1024  }
 0x9b1   :  { %v310_v54 = vsub.f32 1.0, %v309_v53 }
 0x9b3   :  { %v311_v55 = vmul.f32 %v623_v52, %v310_v54 }
 0x9b5   :  { %v312_v56 = vadd.f32 %v623_v52, %v311_v55 }
 0x9b7   :  { %v316_v59 = vsel %vm315_vm3, %v623_v52, %v312_v56 }
 0x9b8   :  { %v321_v62 = vsel %vm318_vm5, %v320_v60, %v316_v59  ;;  %v578_v59 = vld [vmem:[%s764_s0 + $0xe] sm:$0x3] }
 0x9b9   :  { %v324_v0 = vmul.f32 %v321_v62, %v270_v40 }
 0xa16   :  { %v327_v61 = vpop.permute.xlu1 %326 }
 0xa17   :  { %v329_v63 = vmul.f32 %v327_v61, %v321_v62 }
 0xa19   :  { %331 = vrot.lane.b32.xlu2 %v329_v63, %s651_s24 }
 0xa73   :  { %v332_v1 = vpop.permute.xlu2 %331 }
 0xa74   :  { %v334_v2 = vadd.f32 %v332_v1, %v324_v0 }
 0xa76   :  { %624 = vtanh.f32 %v334_v2 }
 0xa7c   :  { %v625_v3 = vpop.eup %624 }
 0xa7d   :  { %337 = vrot.lane.b32.xlu0 %v625_v3, %s651_s24 }
 0xaef   :  { %v338_v4 = vpop.permute.xlu0 %337 }
 0xaf0   :  { %v340_v5 = vmul.f32 %v338_v4, %v321_v62 }
 0xaf2   :  { %344 = vrot.lane.b32.xlu1 %v340_v5, %s652_s25 }
 0xb64   :  { %v345_v6 = vpop.permute.xlu1 %344 }
 0xb65   :  { %573 = vmatmul.msk.f32.vlgmr.msrb.gmra.mxu1 %vm24_vm4, %v345_v6 }
 0xbe2   :  { %v365_v8 = vpop.f32.mrf.mxu1 }
 0xbe3   :  { %v366_v9 = vadd.f32 %v572_v7, %v365_v8 }
 0xbe5   :  { %626 = vtanh.f32 %v366_v9  ;;  %v574_v11 = vmul.f32 -1.442695, %v366_v9 }
 0xbe7   :  { %628 = vpow2.f32 %v574_v11 }
 0xbeb   :  { %v627_v10 = vpop.eup %626 }
 0xbec   :  { %390 = vrot.lane.b32.xlu2 %v627_v10, %s651_s24 }
 0xbed   :  { %v629_v12 = vpop.eup %628 }
 0xbee   :  { %v371_v13 = vadd.f32 1.0, %v629_v12 }
 0xbf0   :  { %630 = vrcp.f32 %v371_v13  ;;  %v383_v19 = vand.u32 2147483648, %v371_v13  ;;  %vm377_vm7 = vweird.f32 %v371_v13  ;;  %v381_v20 = vand.u32 2147483647, %v371_v13 }
 0xbf2   :  { %v384_v22 = vor.u32 1.1754944e-38, %v383_v19  ;;  %vm382_vm9 = vcmp.eq.f32.partialorder %v381_v20, 8.507059e+37 }
 0xbf6   :  { %v631_v14 = vpop.eup %630 }
 0xbf7   :  { %v373_v15 = vmul.f32 %v631_v14, %v371_v13  ;;  %vm378_vm6 = vweird.f32 %v631_v14 }
 0xbf8   :  { %vm379_vm8 = vmor %vm377_vm7, %vm378_vm6 }
 0xbf9   :  { %v374_v16 = vsub.f32 1.0, %v373_v15 }
 0xbfb   :  { %v375_v17 = vmul.f32 %v631_v14, %v374_v16 }
 0xbfd   :  { %v376_v18 = vadd.f32 %v631_v14, %v375_v17 }
 0xbff   :  { %v380_v21 = vsel %vm379_vm8, %v631_v14, %v376_v18  ;;  %v584_v14 = vld [vmem:[%s765_s2] ss:$0 sm:$0xff] }
 0xc00   :  { %v385_v24 = vsel %vm382_vm9, %v384_v22, %v380_v21 }
 0xc01   :  { %v388_v26 = vmul.f32 %v385_v24, %v334_v2 }
 0xc46   :  { %v391_v23 = vpop.permute.xlu2 %390 }
 0xc47   :  { %v393_v25 = vmul.f32 %v391_v23, %v385_v24  ;;  %v9_v23 = vstv %s766_s3 }
 0xc48   :  { %10 = vst [vmem:[#allocation2] sm:$0x1] %v9_v23 }
 0xc49   :  { %395 = vrot.lane.b32.xlu0 %v393_v25, %s651_s24 }
 0xcbb   :  { %v396_v27 = vpop.permute.xlu0 %395 }
 0xcbc   :  { %v398_v28 = vadd.f32 %v396_v27, %v388_v26  ;;  %v585_v26 = vld [vmem:[#allocation2] ss:$0 sm:$0xff] }
 0xcbe   :  { %632 = vtanh.f32 %v398_v28 }
 0xcc4   :  { %v633_v29 = vpop.eup %632 }
 0xcc5   :  { %401 = vrot.lane.b32.xlu1 %v633_v29, %s651_s24 }
 0xd37   :  { %v402_v30 = vpop.permute.xlu1 %401 }
 0xd38   :  { %v404_v31 = vmul.f32 %v402_v30, %v385_v24 }
 0xd3a   :  { %408 = vrot.lane.b32.xlu2 %v404_v31, %s652_s25 }
 0xd94   :  { %v409_v32 = vpop.permute.xlu2 %408 }
 0xd95   :  { %576 = vmatmul.msk.f32.vlgmr.msrb.gmra.mxu2 %vm24_vm4, %v409_v32 }
 0xe18   :  { %v429_v34 = vpop.f32.mrf.mxu2 }
 0xe19   :  { %v430_v35 = vadd.f32 %v575_v33, %v429_v34 }
 0xe1b   :  { %634 = vtanh.f32 %v430_v35  ;;  %v577_v37 = vmul.f32 -1.442695, %v430_v35 }
 0xe1d   :  { %636 = vpow2.f32 %v577_v37 }
 0xe21   :  { %v635_v36 = vpop.eup %634 }
 0xe22   :  { %454 = vrot.lane.b32.xlu0 %v635_v36, %s651_s24 }
 0xe23   :  { %v637_v38 = vpop.eup %636 }
 0xe24   :  { %v435_v39 = vadd.f32 1.0, %v637_v38 }
 0xe26   :  { %638 = vrcp.f32 %v435_v39  ;;  %v447_v45 = vand.u32 2147483648, %v435_v39  ;;  %vm441_vm11 = vweird.f32 %v435_v39  ;;  %v445_v46 = vand.u32 2147483647, %v435_v39 }
 0xe28   :  { %v448_v48 = vor.u32 1.1754944e-38, %v447_v45  ;;  %vm446_vm13 = vcmp.eq.f32.partialorder %v445_v46, 8.507059e+37 }
 0xe2c   :  { %v639_v40 = vpop.eup %638 }
 0xe2d   :  { %v437_v41 = vmul.f32 %v639_v40, %v435_v39  ;;  %vm442_vm10 = vweird.f32 %v639_v40 }
 0xe2e   :  { %vm443_vm12 = vmor %vm441_vm11, %vm442_vm10 }
 0xe2f   :  { %v438_v42 = vsub.f32 1.0, %v437_v41 }
 0xe31   :  { %v439_v43 = vmul.f32 %v639_v40, %v438_v42 }
 0xe33   :  { %v440_v44 = vadd.f32 %v639_v40, %v439_v43 }
 0xe35   :  { %v444_v47 = vsel %vm443_vm12, %v639_v40, %v440_v44 }
 0xe36   :  { %v449_v50 = vsel %vm446_vm13, %v448_v48, %v444_v47 }
 0xe37   :  { %v452_v52 = vmul.f32 %v449_v50, %v398_v28 }
 0xe94   :  { %v455_v49 = vpop.permute.xlu0 %454 }
 0xe95   :  { %v457_v51 = vmul.f32 %v455_v49, %v449_v50 }
 0xe97   :  { %459 = vrot.lane.b32.xlu1 %v457_v51, %s651_s24 }
 0xf09   :  { %v460_v53 = vpop.permute.xlu1 %459 }
 0xf0a   :  { %v462_v54 = vadd.f32 %v460_v53, %v452_v52 }
 0xf0c   :  { %640 = vtanh.f32 %v462_v54 }
 0xf12   :  { %v641_v55 = vpop.eup %640 }
 0xf13   :  { %465 = vrot.lane.b32.xlu2 %v641_v55, %s651_s24 }
 0xf6d   :  { %v466_v56 = vpop.permute.xlu2 %465 }
 0xf6e   :  { %v468_v57 = vmul.f32 %v466_v56, %v449_v50 }
 0xf70   :  { %472 = vrot.lane.b32.xlu0 %v468_v57, %s652_s25 }
 0xfe2   :  { %v473_v58 = vpop.permute.xlu0 %472 }
 0xfe3   :  { %579 = vmatmul.msk.f32.vlgmr.msrb.gmra.mxu3 %vm24_vm4, %v473_v58 }
0x1066   :  { %v493_v60 = vpop.f32.mrf.mxu3 }
0x1067   :  { %v494_v61 = vadd.f32 %v578_v59, %v493_v60 }
0x1069   :  { %642 = vtanh.f32 %v494_v61  ;;  %v580_v63 = vmul.f32 -1.442695, %v494_v61 }
0x106b   :  { %644 = vpow2.f32 %v580_v63 }
0x106f   :  { %v643_v62 = vpop.eup %642 }
0x1070   :  { %518 = vrot.lane.b32.xlu1 %v643_v62, %s651_s24 }
0x1071   :  { %v645_v0 = vpop.eup %644 }
0x1072   :  { %v499_v1 = vadd.f32 1.0, %v645_v0 }
0x1074   :  { %646 = vrcp.f32 %v499_v1  ;;  %v511_v7 = vand.u32 2147483648, %v499_v1  ;;  %vm505_vm14 = vweird.f32 %v499_v1  ;;  %v509_v8 = vand.u32 2147483647, %v499_v1 }
0x1076   :  { %v512_v10 = vor.u32 1.1754944e-38, %v511_v7  ;;  %vm510_vm0 = vcmp.eq.f32.partialorder %v509_v8, 8.507059e+37 }
0x1078   :  { %536 = vrot.lane.b32.xlu1 %v584_v14, %s652_s25 }
0x107a   :  { %v647_v2 = vpop.eup %646 }
0x107b   :  { %v501_v3 = vmul.f32 %v647_v2, %v499_v1  ;;  %vm506_vm4 = vweird.f32 %v647_v2 }
0x107c   :  { %vm507_vm15 = vmor %vm505_vm14, %vm506_vm4 }
0x107d   :  { %v502_v4 = vsub.f32 1.0, %v501_v3 }
0x107f   :  { %v503_v5 = vmul.f32 %v647_v2, %v502_v4 }
0x1081   :  { %v504_v6 = vadd.f32 %v647_v2, %v503_v5 }
0x1083   :  { %v508_v9 = vsel %vm507_vm15, %v647_v2, %v504_v6 }
0x1084   :  { %v513_v12 = vsel %vm510_vm0, %v512_v10, %v508_v9 }
0x1085   :  { %v516_v15 = vmul.f32 %v513_v12, %v462_v54 }
0x10e2   :  { %v519_v11 = vpop.permute.xlu1 %518 }
0x10e3   :  { %v521_v13 = vmul.f32 %v519_v11, %v513_v12 }
0x10e5   :  { %523 = vrot.lane.b32.xlu2 %v521_v13, %s651_s24 }
0x10ea   :  { %v537_v20 = vpop.permute.xlu1 %536 }
0x113f   :  { %v524_v16 = vpop.permute.xlu2 %523 }
0x1140   :  { %v526_v17 = vadd.f32 %v524_v16, %v516_v15 }
0x1142   :  { %648 = vtanh.f32 %v526_v17 }
0x1148   :  { %v649_v18 = vpop.eup %648 }
0x1149   :  { %529 = vrot.lane.b32.xlu0 %v649_v18, %s651_s24 }
0x11bb   :  { %v530_v19 = vpop.permute.xlu0 %529 }
0x11bc   :  { %v532_v21 = vmul.f32 %v530_v19, %v513_v12 }
0x11be   :  { %v539_v22 = vmul.f32 %v537_v20, %v532_v21 }
0x11c0   :  { %541 = vrot.lane.b32.xlu2 %v539_v22, %s652_s25 }
0x121a   :  { %v542_v24 = vpop.permute.xlu2 %541 }
0x121b   :  { %v545_v25 = vsel %vm544_vm1, %v542_v24, 0.0 }
0x121c   :  { %546 = vadd.xlane.f32.xlu0 %v545_v25 }
0x128f   :  { %v547_v27 = vpop.xlane.xlu0 %546 }
0x1290   :  { %v552_v28 = vadd.f32 %v585_v26, %v547_v27 }
0x1292   :  { %554 = vst.msk [vmem:[%s767_s4] sm:$0x3] %vm553_vm2, %v552_v28 }

</bundles_post_ra>
